<compile_context>
chip_gen: v6e
topology: v6e:2x2x1
jax: 0.10.0
libtpu: 0.0.40
codegen_flags: <defaults>
</compile_context>

<pallas_src>
import jax
import jax.numpy as jnp
from jax.experimental import pallas as pl
from jax.experimental.pallas import tpu as pltpu


_LANE = 128
# Per-block VMEM cap (bytes).  in + out, x2 double-buffered => 4x this in
# flight: 4 * 2 MiB = 8 MiB, safely under the 16 MiB default scoped VMEM on
# v5e and well under 32 MiB on v6e/v7x.
_BLOCK_BYTES_CAP = 2 * 1024 * 1024
_MAX_LANES = 4096  # lane width of the flat slab (multiple of 128)


def _copy_kernel(x_ref, o_ref):
    # (tb, lanes) lane-dense, sublane-dense VMEM tiles; pure unmasked copy.
    o_ref[...] = x_ref[...]


def _sublane_pack(dtype):
    """Rows per vreg for this dtype (sub-32-bit dtypes pack along sublanes)."""
    itemsize = jnp.dtype(dtype).itemsize
    if itemsize >= 4:
        return 8
    if itemsize == 2:
        return 16
    return 32


def _slab_geometry(total, dtype):
    """Pick (rows, lanes, tile_rows) for a flat (rows, lanes) slab.

    Preconditions: total % (pack * 128) == 0.
    Guarantees: lanes % 128 == 0, rows % pack == 0, tile_rows % pack == 0,
    tile_rows divides rows, and tile_rows * lanes * itemsize <= _BLOCK_BYTES_CAP.
    """
    pack = _sublane_pack(dtype)
    itemsize = jnp.dtype(dtype).itemsize
    per_pack = total // pack  # multiple of 128 by construction

    # Largest multiple of 128 (<= _MAX_LANES) that divides per_pack, so that
    # rows = total // lanes is automatically a multiple of `pack`.
    lanes = min(_MAX_LANES, per_pack)
    lanes = (lanes // _LANE) * _LANE
    while per_pack % lanes != 0:
        lanes -= _LANE
    rows = total // lanes

    # Prefer >= 2 row-tiles (v7x megacore) for small slabs: trade lane width
    # (still >= 128, still unmasked) for rows.  Large slabs never enter this.
    while rows < 2 * pack and lanes > _LANE:
        cand = lanes - _LANE
        while per_pack % cand != 0:
            cand -= _LANE
        lanes = cand
        rows = total // lanes

    # Row tile: largest multiple of `pack` dividing rows with block bytes
    # under the cap.
    max_tb_by_bytes = max(pack, (_BLOCK_BYTES_CAP // (lanes * itemsize)) // pack * pack)
    tb = min(rows, max_tb_by_bytes)
    tb = (tb // pack) * pack
    while rows % tb != 0:
        tb -= pack

    # Guarantee >= 2 grid programs when the slab is big enough (v7x: 2 TCs).
    if rows // tb < 2 and rows >= 2 * pack:
        tb = ((rows // 2) // pack) * pack
        while rows % tb != 0:
            tb -= pack

    return rows, lanes, tb


def lambda_flatten(x, materialize=True):
    """Pallas implementation of Lambda(lambda x: x.view(x.size(0), -1)).

    materialize=False is the recommended production path: the flatten is a
    zero-cost metadata reshape and should be fused into the consumer's
    BlockSpec rather than copied through HBM.  materialize=True runs the
    tiled lane-dense copy kernel (fusion-host placeholder).
    """
    n = x.shape[0]
    f = 1
    for d in x.shape[1:]:
        f *= d

    # Free metadata reshape; matches torch x.view(x.size(0), -1) for
    # contiguous inputs.
    x2 = x.reshape(n, f)
    if not materialize:
        return x2

    dtype = x.dtype
    pack = _sublane_pack(dtype)
    unit = pack * _LANE
    total = n * f

    flat = x2.reshape(total)
    pad = (-total) % unit
    if pad:
        # Degenerate (non-aligned) path only: pad up to the alignment unit
        # instead of falling back to a giant full-dim block.
        flat = jnp.concatenate([flat, jnp.zeros((pad,), dtype)])
    padded_total = total + pad

    rows, lanes, tb = _slab_geometry(padded_total, dtype)
    slab = flat.reshape(rows, lanes)

    grid = (rows // tb,)
    out = pl.pallas_call(
        _copy_kernel,
        out_shape=jax.ShapeDtypeStruct((rows, lanes), dtype),
        grid=grid,
        in_specs=[pl.BlockSpec((tb, lanes), lambda i: (i, 0))],
        out_specs=pl.BlockSpec((tb, lanes), lambda i: (i, 0)),
        compiler_params=pltpu.CompilerParams(
            dimension_semantics=("parallel",),
        ),
    )(slab)

    out_flat = out.reshape(padded_total)
    if pad:
        out_flat = out_flat[:total]
    return out_flat.reshape(n, f)


if __name__ == "__main__":
    key = jax.random.PRNGKey(0)
    # Small shapes consistent with an inception-style activation: N=2, C=4, 16x16.
    x = jax.random.normal(key, (2, 4, 16, 16), dtype=jnp.float32)

    out = lambda_flatten(x, materialize=True)
    out = jax.block_until_ready(out)

    # Reference: exact semantics of torch x.view(x.size(0), -1).
    ref = x.reshape(x.shape[0], -1)

    assert out.shape == ref.shape, (out.shape, ref.shape)
    assert out.dtype == ref.dtype, (out.dtype, ref.dtype)
    assert bool(jnp.array_equal(out, ref)), "mismatch vs reference flatten"

    # Recommended fused path is also exact (and free).
    fused = lambda_flatten(x, materialize=False)
    assert bool(jnp.array_equal(fused, ref)), "mismatch vs reference flatten (fused)"

    print("KERNEL_OK")
</pallas_src>

<mosaic_0001>
module attributes {stable_mosaic.version = 11 : i64} {
  func.func @_copy_kernel(%arg0: i32, %arg1: memref<8x128xf32, #tpu.memory_space<vmem>>, %arg2: memref<8x128xf32, #tpu.memory_space<vmem>>) attributes {dimension_semantics = [#tpu.dimension_semantics<parallel>], iteration_bounds = array<i64: 2>, scalar_prefetch = 0 : i64, scratch_operands = 0 : i64, tpu.core_type = #tpu.core_type<tc>, window_params = [{transform_indices = @transform_0, window_bounds = array<i64: 8, 128>}, {transform_indices = @transform_1, window_bounds = array<i64: 8, 128>}]} {
    %c0 = arith.constant 0 : index
    %c0_0 = arith.constant 0 : index
    %0 = vector.load %arg1[%c0, %c0_0] : memref<8x128xf32, #tpu.memory_space<vmem>>, vector<8x128xf32>
    %c0_1 = arith.constant 0 : index
    %c0_2 = arith.constant 0 : index
    %1 = vector.load %arg2[%c0_1, %c0_2] : memref<8x128xf32, #tpu.memory_space<vmem>>, vector<8x128xf32>
    tpu.vector_store %arg2[%c0_1, %c0_2], %0 {strides = array<i32>} : memref<8x128xf32, #tpu.memory_space<vmem>>, vector<8x128xf32>,
    return
  }
  func.func @transform_0(%arg0: i32) -> (i32, i32) {
    %c0_i32 = arith.constant 0 : i32
    %c0_i32_0 = arith.constant 0 : i32
    return %arg0, %c0_i32 : i32, i32
  }
  func.func @transform_1(%arg0: i32) -> (i32, i32) {
    %c0_i32 = arith.constant 0 : i32
    %c0_i32_0 = arith.constant 0 : i32
    return %arg0, %c0_i32 : i32, i32
  }
}

</mosaic_0001>

<bundles_post_ra>
// kernel: tpu_custom_call.1
= control target key start
LH: loop header
LB: loop body
LE: loop exit
PB: predicated region body
PF: predicated region fallthrough
CT: control target
= control target key end

     0   :  { %6 = vsyncpa [#allocation3], 0  ;;  %s529_s0 = inlined_call_operand.hbm [shape: f32[16,128], index: 0, kind: input, shape index: {}]   ;;  %s530_s1 = inlined_call_operand.hbm [shape: f32[16,128], index: 1, kind: output, shape index: {}]  }
   0x1   :  { %8 = vsyncpa [#allocation3 + $0x1], 0 }
   0x2   :  { %9 = vsyncpa [#allocation4], 0 }
   0x3   :  { %11 = vsyncpa [#allocation4 + $0x1], 0  ;;  %s382_s6 = smov 0   ;;  %s384_s7 = smov 0  }
   0x4   :  { %s386_s8 = smov 0   ;;  %s388_s9 = smov 0  }
   0x5 LB: > { %s403_s10 = sadd.s32 4294967295, %s368_s9   ;;  %s218_s11 = sadd.s32 4294967294, %s368_s9   ;;  %s368_s9 = sphi %s388_s9, %s547_s9   ;;  %s364_s8 = sphi %s386_s8, %s546_s8   ;;  %s360_s7 = sphi %s384_s7, %s545_s7   ;;  %s356_s6 = sphi %s382_s6, %s544_s6  }
   0x6   : > { %s407_s12 = sadd.s32 1, %s368_s9   ;;  %s24_s13 = sadd.s32 1, %s364_s8 }
   0x7   : > { %s21_s14 = ssub.s32 %s368_s9, %s407_s12  ;;  %p31_p0 = scmp.ne.s32.totalorder %s364_s8, %s360_s7 }
   0x8   : > { %p22_p1 = scmp.eq.s32.totalorder %s21_s14, 0  ;;  %p32_p2 = scmp.eq.s32.totalorder %s368_s9, 0 }
   0x9   : > { %p37_p3 = scmp.ne.s32.totalorder %s360_s7, %s356_s6  ;;  %p38_p4 = scmp.eq.s32.totalorder %s403_s10, 0 }
   0xa   : > { %s419_s15 = scalar_select %p22_p1, %s364_s8, %s24_s13  }
   0xb   : > { %p421_p5 = por %p32_p2, %p31_p0  ;;  %p425_p6 = por %p38_p4, %p37_p3 }
   0xc   : > { %p61_p7 = scmp.eq.s32.totalorder %s403_s10, 1  ;;  %p67_p8 = scmp.eq.s32.totalorder %s218_s11, 1 }
   0xd   : > { %s534_s17 = scalar_select %p425_p6, 1, 0 }
   0xe   : > { %p242_p10 = scmp.lt.s32.totalorder %s368_s9, 2  ;;  %p432_p11 = por %p61_p7, %p31_p0 }
   0xf   : > { %p436_p12 = por %p67_p8, %p37_p3  ;;  %s87_s20 = sand.u32 1, %s364_s8  }
  0x10   : > { %s535_s18 = scalar_select %p432_p11, 1, 0 }
  0x11   : > { %s536_s19 = scalar_select %p436_p12, 1, 0 }
  0x12   : > { %s222_s21 = sshll.u32 %s368_s9, 7  ;;  %s221_s22 = sshll.u32 %s87_s20, 3 }
  0x13   : > { %s445_s25 = scalar_lea.hbm %s529_s0, %s222_s21  ;;  %s91_s26 = scalar_lea.vmem [#allocation2], %s221_s22 }
  0x14   : > { %s98_s27 = sshll.u32 %s91_s26, 4  ;;  %p449_p13 = pnand %p242_p10, %p421_p5  ;;  %s453_s27 = int_to_ptr.vmem [resolvable:$true] %s98_s27 }
  0x15   : > { %s88_s29 = scalar_lea.sflag [#allocation3], %s87_s20  ;;  %s276_s30 = scalar_lea.hbm %s445_s25, 128 }
  0x16   : > { %p277_p2 = scmp.ne.s32.totalorder %s445_s25, %s276_s30  ;;  %p278_p3 = pneg %p449_p13 }
  0x17   : > { %s281_s4 = scalar_lea.hbm %s529_s0, 256  ;;  %p282_p5 = scmp.lt.s32.totalorder %s445_s25, %s529_s0 }
  0x18   : > { %p279_p4 = pnand %p278_p3, %p277_p2  ;;  %p283_p8 = scmp.lt.s32.totalorder %s281_s4, %s276_s30 }
  0x1a   : > { %p280_p7 = pneg %p279_p4  ;;  %p284_p10 = por %p283_p8, %p282_p5 }
  0x1c   : > { %p285_p9 = pnand %p284_p10, %p280_p7 }
  0x1e   : > { %288 = shalt.err (!%p285_p9)
}
  0x1f   : > { %s289_s13 = scalar_lea.vmem %s453_s27, 128  ;;  %s370_s14 = smov [#allocation2]  }
  0x20   : > { %p290_p0 = scmp.ne.s32.totalorder %s453_s27, %s289_s13  ;;  %s294_s16 = sshll.u32 %s370_s14, 4  ;;  %s295_s16 = int_to_ptr.vmem [resolvable:$false] %s294_s16 }
  0x21   : > { %s296_s20 = scalar_lea.vmem %s295_s16, 256  ;;  %p297_p4 = scmp.lt.s32.totalorder %s453_s27, %s295_s16 }
  0x22   : > { %p292_p1 = pnand %p290_p0, %p278_p3  ;;  %p298_p12 = scmp.lt.s32.totalorder %s296_s20, %s289_s13 }
  0x24   : > { %p293_p2 = pneg %p292_p1  ;;  %p299_p11 = por %p298_p12, %p297_p4 }
  0x26   : > { %p300_p6 = pnand %p299_p11, %p293_p2 }
  0x28   : > { %303 = shalt.err (!%p300_p6)
}
  0x29   : > { %237 = dma.hbm_to_vmem [thread:$0]  (!%p449_p13), %s445_s25, 128, %s453_s27, %s88_s29  }
  0x2a   : > { %p538_p9 = scmp.lt.s32.totalorder %s368_s9, 3  ;;  %p539_p7 = scmp.ge.s32.totalorder %s368_s9, 1 }
  0x2c   : > { %p104_p0 = pnand %p539_p7, %p538_p9 }
  0x2d   : > { %s480_s21 = sand.u32 (!%p104_p0), 1, %s360_s7   ;;  %p540_p6 = scmp.ne.s32.totalorder (!%p104_p0), %s534_s17, 0 }
  0x2e   : > { %107 = sbr.rel (%p104_p0) target bundleno = 77 (0x4d), region = 24  ;;  %s224_s22 = sshll.u32 (!%p104_p0), %s480_s21, 3 }
  0x2f   : > { %s110_s23 = scalar_lea.sflag (!%p104_p0), [#allocation3], %s480_s21  ;;  %s113_s24 = scalar_lea.vmem (!%p104_p0), [#allocation2], %s224_s22 }
  0x33   : > { %347 = dma.done.wait (%p540_p6), %s110_s23, 128  }
  0x34   : > { %349 = vsyncadd (%p540_p6), %s110_s23, 4294967168  ;;  %s131_s25 = scalar_lea.vmem [#allocation5], %s224_s22  ;;  %s227_s27 = sshll.u32 %s403_s10, 7  ;;  %v132_v0 = vld [vmem:[%s113_s24] sm:$0xff] }
  0x35   : > { %s148_s26 = sshll.u32 %s131_s25, 4  ;;  %s146_s30 = scalar_lea.hbm %s530_s1, %s227_s27  ;;  %133 = vst [vmem:[%s131_s25] sm:$0xff] %v132_v0  ;;  %s489_s26 = int_to_ptr.vmem [resolvable:$true] %s148_s26 }
  0x36   : > { %s135_s2 = scalar_lea.sflag [#allocation4], %s480_s21  ;;  %s304_s17 = scalar_lea.vmem %s489_s26, 128 }
  0x37   : > { %p305_p11 = scmp.ne.s32.totalorder %s489_s26, %s304_s17  ;;  %p541_p12 = scmp.ne.s32.totalorder %s535_s18, 0 }
  0x38   : > { %s371_s3 = smov [#allocation5]  }
  0x39   : > { %p306_p13 = pnand %p305_p11, %p541_p12  ;;  %s308_s4 = sshll.u32 %s371_s3, 4  ;;  %s309_s4 = int_to_ptr.vmem [resolvable:$false] %s308_s4 }
  0x3a   : > { %s310_s10 = scalar_lea.vmem %s309_s4, 256  ;;  %p311_p3 = scmp.lt.s32.totalorder %s489_s26, %s309_s4 }
  0x3b   : > { %p307_p1 = pneg %p306_p13  ;;  %p312_p5 = scmp.lt.s32.totalorder %s310_s10, %s304_s17 }
  0x3d   : > { %p313_p8 = por %p312_p5, %p311_p3 }
  0x3f   : > { %p314_p10 = pnand %p313_p8, %p307_p1 }
  0x41   : > { %317 = shalt.err (!%p314_p10)
}
  0x42   : > { %s318_s5 = scalar_lea.hbm %s146_s30, 128  ;;  %s322_s14 = scalar_lea.hbm %s530_s1, 256 }
  0x43   : > { %p319_p2 = scmp.ne.s32.totalorder %s146_s30, %s318_s5  ;;  %p323_p7 = scmp.lt.s32.totalorder %s146_s30, %s530_s1 }
  0x44   : > { %p324_p0 = scmp.lt.s32.totalorder %s322_s14, %s318_s5 }
  0x45   : > { %p320_p4 = pnand %p319_p2, %p541_p12 }
  0x46   : > { %p325_p6 = por %p324_p0, %p323_p7 }
  0x47   : > { %p321_p9 = pneg %p320_p4 }
  0x49   : > { %p326_p11 = pnand %p325_p6, %p321_p9 }
  0x4b   : > { %329 = shalt.err (!%p326_p11)
}
  0x4c   : > { %232 = dma.vmem_to_hbm [thread:$0]  (%p541_p12), %s489_s26, 128, %s146_s30, %s135_s2  }
  0x4d PF: > { %s160_s21 = sand.u32 1, %s356_s6   ;;  %p542_p13 = scmp.ne.s32.totalorder %s536_s19, 0 }
  0x4e   : > { %p543_p1 = scmp.ge.s32.totalorder %s368_s9, 2  ;;  %s161_s22 = scalar_lea.sflag [#allocation4], %s160_s21 }
  0x50   : > { %p239_p3 = pnand %p543_p1, %p542_p13 }
  0x52   : > { %p240_p5 = pneg %p239_p3 }
  0x54   : > { %351 = dma.done.wait (%p240_p5), %s161_s22, 128  }
  0x55   : > { %353 = vsyncadd (%p240_p5), %s161_s22, 4294967168  ;;  %p14_p8 = scmp.ge.s32.totalorder %s407_s12, 4   ;;  %s544_s6 = smov %s360_s7 }
  0x56   : > { %s545_s7 = smov %s364_s8  ;;  %s546_s8 = smov %s419_s15 }
  0x57   : > { %s547_s9 = smov %s407_s12  ;;  %16 = sbr.rel (!%p14_p8) target bundleno = 5 (0x5), region = 69 }
  0x5c   :  { %166 = vsyncpa [#allocation3], 1 }
  0x5d   :  { %168 = vsyncpa [#allocation3 + $0x1], 1 }
  0x5e   :  { %169 = vsyncpa [#allocation4], 1 }
  0x5f   :  { %171 = vsyncpa [#allocation4 + $0x1], 1 }

</bundles_post_ra>
